<compile_context>
chip_gen: v7x
topology: tpu7x:2x2x1
jax: 0.10.0
libtpu: 0.0.40
codegen_flags: <defaults>
</compile_context>

<pallas_src>
import functools
import math

import jax
import jax.numpy as jnp
from jax.experimental import pallas as pl
from jax.experimental.pallas import tpu as pltpu


def _contrastive_loss_kernel(y_pred_ref, y_true_ref, out_ref, acc_ref, *,
                             m, rows, row_tile, tiles_per_split):
    c = pl.program_id(0)          # TensorCore split ("parallel")
    i = pl.program_id(1)          # row-tile index within the split ("arbitrary")

    @pl.when(i == 0)
    def _():
        acc_ref[...] = jnp.zeros_like(acc_ref)

    yp = y_pred_ref[...].astype(jnp.float32)
    yt = y_true_ref[...].astype(jnp.float32)

    pos = yt * jnp.square(yp)
    neg = (1.0 - yt) * jnp.square(jnp.maximum(jnp.float32(m) - yp, 0.0))
    val = pos + neg

    # Mask rows that fall outside the real array (partial last tile, or the
    # fully-clamped extra tile the 2nd split may get when the tile count is odd).
    tile_idx = c * tiles_per_split + i            # logical (unclamped) tile id
    row_start = tile_idx * row_tile
    row_ids = row_start + jax.lax.broadcasted_iota(jnp.int32, val.shape, 0)
    val = jnp.where(row_ids < rows, val, 0.0)

    acc_ref[...] += val

    @pl.when(i == pl.num_programs(1) - 1)
    def _():
        out_ref[0, 0] = jnp.sum(acc_ref[...])


def _lane_dense_shape(shape):
    """Pick a 2D (rows, lane_width) view with a 128-multiple lane axis."""
    total = int(math.prod(shape)) if len(shape) else 1
    for w in (512, 256, 128):
        if total % w == 0:
            return total // w, w
    # Fallback: keep the original last dim as the lane axis (full-dim block).
    feat = int(shape[-1]) if len(shape) else 1
    return total // feat, feat


def contrastive_loss(y_pred, y_true, m=1.0):
    """Pallas TPU implementation of ContrastiveLoss.forward (returns a scalar)."""
    assert y_pred.shape == y_true.shape
    shape = y_pred.shape
    total_elems = int(math.prod(shape)) if len(shape) else 1

    # Keep floating dtypes native (bf16 stays bf16 -> half the HBM reads);
    # only promote non-float label dtypes so the kernel can load them.
    if not jnp.issubdtype(y_pred.dtype, jnp.floating):
        y_pred = y_pred.astype(jnp.float32)
    if not jnp.issubdtype(y_true.dtype, jnp.floating):
        y_true = y_true.astype(jnp.float32)

    rows, lane_w = _lane_dense_shape(shape)
    yp2 = y_pred.reshape(rows, lane_w)   # row-major reshape: metadata only, no copy
    yt2 = y_true.reshape(rows, lane_w)

    # Row tile sized for ~1 MiB per input block: big enough to amortize the
    # ~0.35us per-grid-step overhead, small enough that double-buffered inputs
    # plus the f32 accumulator stay ~6 MiB (safe on v7x's smaller VMEM).
    itemsize = max(y_pred.dtype.itemsize, y_true.dtype.itemsize)
    target_rt = ((1 << 20) // (lane_w * itemsize)) // 8 * 8
    target_rt = max(8, min(4096, target_rt))
    if rows <= target_rt:
        row_tile = rows              # single tile; block == full array (always legal)
    else:
        row_tile = target_rt         # multiple of 8; last tile masked in-kernel

    total_tiles = pl.cdiv(rows, row_tile)
    num_splits = 2 if total_tiles >= 2 else 1    # 2-TC megacore split (v7x); serial elsewhere
    tiles_per_split = pl.cdiv(total_tiles, num_splits)
    grid = (num_splits, tiles_per_split)

    if num_splits * tiles_per_split == total_tiles:
        in_map = lambda c, i: (c * tiles_per_split + i, 0)
    else:
        # Odd tile count: the 2nd split gets one extra step; clamp its block
        # index in-bounds (that step is fully masked out inside the kernel).
        last = total_tiles - 1
        in_map = lambda c, i: (jnp.minimum(c * tiles_per_split + i, last), 0)

    # TODO(synk): if `m` ever needs to be a traced/jit-varying value, pass it
    # as an SMEM scalar input instead of a Python-float closure.
    kernel = functools.partial(
        _contrastive_loss_kernel, m=float(m), rows=rows, row_tile=row_tile,
        tiles_per_split=tiles_per_split)

    partials = pl.pallas_call(
        kernel,
        out_shape=jax.ShapeDtypeStruct((num_splits, 1), jnp.float32),
        grid_spec=pltpu.PrefetchScalarGridSpec(
            num_scalar_prefetch=0,
            grid=grid,
            in_specs=[
                pl.BlockSpec((row_tile, lane_w), in_map),
                pl.BlockSpec((row_tile, lane_w), in_map),
            ],
            out_specs=pl.BlockSpec((1, 1), lambda c, i: (c, 0),
                                   memory_space=pltpu.SMEM),
            scratch_shapes=[pltpu.VMEM((row_tile, lane_w), jnp.float32)],
        ),
        compiler_params=pltpu.CompilerParams(
            dimension_semantics=("parallel", "arbitrary")),
    )(yp2, yt2)

    return jnp.sum(partials) / jnp.float32(total_elems)


def contrastive_loss_ref(y_pred, y_true, m=1.0):
    """Pure-JAX reference mirroring the PyTorch forward exactly."""
    loss = jnp.mean(
        y_true * jnp.square(y_pred)
        + (1.0 - y_true) * jnp.square(jnp.maximum(m - y_pred, 0.0)),
        axis=-1, keepdims=True)
    return jnp.mean(loss)


if __name__ == "__main__":
    key = jax.random.PRNGKey(0)
    k1, k2, k3, k4 = jax.random.split(key, 4)

    # Small shapes consistent with the module (sigmoid-like predictions,
    # binary labels).
    batch, feat = 8, 128
    y_pred = jax.nn.sigmoid(
        jax.random.normal(k1, (batch, feat), dtype=jnp.float32))
    y_true = (jax.random.uniform(k2, (batch, feat)) > 0.5).astype(jnp.float32)

    out = jax.block_until_ready(contrastive_loss(y_pred, y_true, m=1.0))
    ref = contrastive_loss_ref(y_pred, y_true, m=1.0)
    assert jnp.allclose(out, ref, rtol=1e-5, atol=1e-6), (out, ref)

    # Larger case exercising multi-tile grid, the 2-way split, the clamped
    # extra tile and partial-tile masking (~2.5 MiB per input, still fast).
    big_shape = (5000, 128)
    yp_b = jax.nn.sigmoid(jax.random.normal(k3, big_shape, dtype=jnp.float32))
    yt_b = (jax.random.uniform(k4, big_shape) > 0.5).astype(jnp.float32)
    out_b = jax.block_until_ready(contrastive_loss(yp_b, yt_b, m=1.0))
    ref_b = contrastive_loss_ref(yp_b, yt_b, m=1.0)
    assert jnp.allclose(out_b, ref_b, rtol=1e-4, atol=1e-6), (out_b, ref_b)

    print("KERNEL_OK")
</pallas_src>

<mosaic_0001>
module attributes {stable_mosaic.version = 11 : i64} {
  func.func @_contrastive_loss_kernel(%arg0: i32, %arg1: i32, %arg2: memref<2x512xf32, #tpu.memory_space<vmem>>, %arg3: memref<2x512xf32, #tpu.memory_space<vmem>>, %arg4: memref<1x1xf32, #tpu.memory_space<smem>>, %arg5: memref<2x512xf32, #tpu.memory_space<vmem>>) attributes {dimension_semantics = [#tpu.dimension_semantics<parallel>, #tpu.dimension_semantics<arbitrary>], iteration_bounds = array<i64: 1, 1>, scalar_prefetch = 0 : i64, scratch_operands = 1 : i64, tpu.core_type = #tpu.core_type<tc>, window_params = [{transform_indices = @transform_0, window_bounds = array<i64: 2, 512>}, {transform_indices = @transform_1, window_bounds = array<i64: 2, 512>}, {transform_indices = @transform_2, window_bounds = array<i64: 1, 1>}]} {
    %c0_i32 = arith.constant 0 : i32
    %0 = arith.cmpi eq, %arg1, %c0_i32 : i32
    %1 = arith.extui %0 : i1 to i32
    %c0_i32_0 = arith.constant 0 : i32
    %2 = arith.cmpi ne, %1, %c0_i32_0 : i32
    scf.if %2 {
      %cst_14 = arith.constant 0.000000e+00 : f32
      %32 = vector.broadcast %cst_14 : f32 to vector<2x512xf32>
      %c0_15 = arith.constant 0 : index
      %c0_16 = arith.constant 0 : index
      %33 = vector.load %arg5[%c0_15, %c0_16] : memref<2x512xf32, #tpu.memory_space<vmem>>, vector<2x512xf32>
      tpu.vector_store %arg5[%c0_15, %c0_16], %32 {strides = array<i32>} : memref<2x512xf32, #tpu.memory_space<vmem>>, vector<2x512xf32>,
    } else {
    }
    %c0 = arith.constant 0 : index
    %c0_1 = arith.constant 0 : index
    %3 = vector.load %arg2[%c0, %c0_1] : memref<2x512xf32, #tpu.memory_space<vmem>>, vector<2x512xf32>
    %c0_2 = arith.constant 0 : index
    %c0_3 = arith.constant 0 : index
    %4 = vector.load %arg3[%c0_2, %c0_3] : memref<2x512xf32, #tpu.memory_space<vmem>>, vector<2x512xf32>
    %5 = arith.mulf %3, %3 : vector<2x512xf32>
    %6 = arith.mulf %4, %5 : vector<2x512xf32>
    %cst = arith.constant 1.000000e+00 : f32
    %7 = vector.broadcast %cst : f32 to vector<2x512xf32>
    %8 = arith.subf %7, %4 : vector<2x512xf32>
    %cst_4 = arith.constant 1.000000e+00 : f32
    %9 = vector.broadcast %cst_4 : f32 to vector<2x512xf32>
    %10 = arith.subf %9, %3 : vector<2x512xf32>
    %cst_5 = arith.constant 0.000000e+00 : f32
    %11 = vector.broadcast %cst_5 : f32 to vector<2x512xf32>
    %12 = arith.maximumf %10, %11 : vector<2x512xf32>
    %13 = arith.mulf %12, %12 : vector<2x512xf32>
    %14 = arith.mulf %8, %13 : vector<2x512xf32>
    %15 = arith.addf %6, %14 : vector<2x512xf32>
    %c1_i32 = arith.constant 1 : i32
    %16 = arith.muli %arg0, %c1_i32 : i32
    %17 = arith.addi %16, %arg1 : i32
    %c2_i32 = arith.constant 2 : i32
    %18 = arith.muli %17, %c2_i32 : i32
    %19 = tpu.iota {dimensions = array<i32: 0>} : vector<2x512xi32>
    %20 = vector.broadcast %18 : i32 to vector<2x512xi32>
    %21 = arith.addi %20, %19 : vector<2x512xi32>
    %c2_i32_6 = arith.constant 2 : i32
    %22 = vector.broadcast %c2_i32_6 : i32 to vector<2x512xi32>
    %23 = arith.cmpi slt, %21, %22 : vector<2x512xi32>
    %cst_7 = arith.constant 0.000000e+00 : f32
    %24 = vector.broadcast %cst_7 : f32 to vector<2x512xf32>
    %25 = arith.select %23, %15, %24 : vector<2x512xi1>, vector<2x512xf32>
    %c0_8 = arith.constant 0 : index
    %c0_9 = arith.constant 0 : index
    %26 = vector.load %arg5[%c0_8, %c0_9] : memref<2x512xf32, #tpu.memory_space<vmem>>, vector<2x512xf32>
    %27 = arith.addf %26, %25 : vector<2x512xf32>
    %c0_10 = arith.constant 0 : index
    %c0_11 = arith.constant 0 : index
    %28 = vector.load %arg5[%c0_10, %c0_11] : memref<2x512xf32, #tpu.memory_space<vmem>>, vector<2x512xf32>
    tpu.vector_store %arg5[%c0_10, %c0_11], %27 {strides = array<i32>} : memref<2x512xf32, #tpu.memory_space<vmem>>, vector<2x512xf32>,
    %c0_i32_12 = arith.constant 0 : i32
    %29 = arith.cmpi eq, %arg1, %c0_i32_12 : i32
    %30 = arith.extui %29 : i1 to i32
    %c0_i32_13 = arith.constant 0 : i32
    %31 = arith.cmpi ne, %30, %c0_i32_13 : i32
    scf.if %31 {
      %c0_14 = arith.constant 0 : index
      %c0_15 = arith.constant 0 : index
      %32 = vector.load %arg5[%c0_14, %c0_15] : memref<2x512xf32, #tpu.memory_space<vmem>>, vector<2x512xf32>
      %33 = vector.shape_cast %32 : vector<2x512xf32> to vector<1x2x512xf32>
      %cst_16 = arith.constant dense<0.000000e+00> : vector<1xf32>
      %34 = vector.multi_reduction <add>, %33, %cst_16 [1, 2] : vector<1x2x512xf32> to vector<1xf32>
      %35 = vector.shape_cast %34 : vector<1xf32> to vector<1x1x1xf32>
      %36 = vector.extract %35[0, 0, 0] : f32 from vector<1x1x1xf32>
      %c0_17 = arith.constant 0 : index
      %c0_18 = arith.constant 0 : index
      %37 = memref.load %arg4[%c0_17, %c0_18] : memref<1x1xf32, #tpu.memory_space<smem>>
      memref.store %36, %arg4[%c0_17, %c0_18] : memref<1x1xf32, #tpu.memory_space<smem>>
    } else {
    }
    return
  }
  func.func @transform_0(%arg0: i32, %arg1: i32) -> (i32, i32) {
    %c1_i32 = arith.constant 1 : i32
    %0 = arith.muli %arg0, %c1_i32 : i32
    %1 = arith.addi %0, %arg1 : i32
    %c0_i32 = arith.constant 0 : i32
    %c0_i32_0 = arith.constant 0 : i32
    return %1, %c0_i32 : i32, i32
  }
  func.func @transform_1(%arg0: i32, %arg1: i32) -> (i32, i32) {
    %c1_i32 = arith.constant 1 : i32
    %0 = arith.muli %arg0, %c1_i32 : i32
    %1 = arith.addi %0, %arg1 : i32
    %c0_i32 = arith.constant 0 : i32
    %c0_i32_0 = arith.constant 0 : i32
    return %1, %c0_i32 : i32, i32
  }
  func.func @transform_2(%arg0: i32, %arg1: i32) -> (i32, i32) {
    %c0_i32 = arith.constant 0 : i32
    %c0_i32_0 = arith.constant 0 : i32
    return %arg0, %c0_i32 : i32, i32
  }
}

</mosaic_0001>

<bundles_post_ra>
// kernel: tpu_custom_call.1
= control target key start
LH: loop header
LB: loop body
LE: loop exit
PB: predicated region body
PF: predicated region fallthrough
CT: control target
= control target key end

     0   :  { %7 = vsyncpa [#allocation4], 0  ;;  %s301_s0 = inlined_call_operand.hbm [shape: f32[2,512], index: 0, kind: input, shape index: {}]   ;;  %s302_s1 = inlined_call_operand.hbm [shape: f32[2,512], index: 1, kind: input, shape index: {}]   ;;  %s303_s2 = inlined_call_operand.hbm [shape: f32[1,1], index: 2, kind: output, shape index: {}]  }
   0x1   :  { %8 = vsyncpa [#allocation7], 0 }
   0x2   :  { %9 = vsyncpa [#allocation5], 0  ;;  %s246_s9 = smov [#allocation3]   ;;  %s247_s11 = smov [#allocation6]  }
   0x3   :  { %s20_s10 = sshll.u32 %s246_s9, 4  ;;  %s34_s12 = sshll.u32 %s247_s11, 4  ;;  %s21_s10 = int_to_ptr.vmem [resolvable:$true] %s20_s10  ;;  %s35_s12 = int_to_ptr.vmem [resolvable:$true] %s34_s12 }
   0x4   :  { %s186_s15 = scalar_lea.hbm %s301_s0, 128 }
   0x5   :  { %p187_p0 = scmp.ne.s32.totalorder %s301_s0, %s186_s15  ;;  %p190_p1 = scmp.lt.u32.totalorder %s186_s15, %s301_s0 }
   0x7   :  { %p192_p2 = pnand %p190_p1, %p187_p0 }
   0x9   :  { %195 = shalt.err (!%p192_p2)
}
   0xa   :  { %s196_s20 = scalar_lea.vmem %s21_s10, 128  ;;  %p201_p4 = scmp.lt.s32.totalorder %s21_s10, %s21_s10 }
   0xb   :  { %p197_p3 = scmp.ne.s32.totalorder %s21_s10, %s196_s20  ;;  %p202_p5 = scmp.lt.s32.totalorder %s196_s20, %s196_s20 }
   0xd   :  { %p203_p6 = por %p202_p5, %p201_p4 }
   0xf   :  { %p204_p7 = pnand %p203_p6, %p197_p3 }
  0x11   :  { %207 = shalt.err (!%p204_p7)
}
  0x12   :  { %23 = dma.hbm_to_vmem [thread:$0]  %s301_s0, 128, %s21_s10, [#allocation4]  }
  0x13   :  { %s208_s25 = scalar_lea.hbm %s302_s1, 128 }
  0x14   :  { %p209_p8 = scmp.ne.s32.totalorder %s302_s1, %s208_s25  ;;  %p212_p9 = scmp.lt.u32.totalorder %s208_s25, %s302_s1 }
  0x16   :  { %p214_p10 = pnand %p212_p9, %p209_p8 }
  0x18   :  { %217 = shalt.err (!%p214_p10)
}
  0x19   :  { %s218_s30 = scalar_lea.vmem %s35_s12, 128  ;;  %p223_p12 = scmp.lt.s32.totalorder %s35_s12, %s35_s12 }
  0x1a   :  { %p219_p11 = scmp.ne.s32.totalorder %s35_s12, %s218_s30  ;;  %p224_p13 = scmp.lt.s32.totalorder %s218_s30, %s218_s30 }
  0x1c   :  { %p225_p0 = por %p224_p13, %p223_p12 }
  0x1e   :  { %p226_p1 = pnand %p225_p0, %p219_p11 }
  0x20   :  { %229 = shalt.err (!%p226_p1)
}
  0x21   :  { %37 = dma.hbm_to_vmem [thread:$0]  %s302_s1, 128, %s35_s12, [#allocation7]  }
  0x22   :  { %240 = dma.done.wait [#allocation4], 128  }
  0x23   :  { %241 = vsyncadd [#allocation4], 4294967168 }
  0x24   :  { %242 = dma.done.wait [#allocation7], 128  }
  0x25   :  { %243 = vsyncadd [#allocation7], 4294967168  ;;  %v63_v0 = vlaneseq  ;;  %v248_v1 = vmov 1983009808   ;;  %v51_v3 = vld [vmem:[#allocation3] sm:$0xff]  ;;  %v52_v4 = vld [vmem:[#allocation6] sm:$0xff] }
  0x26   :  { %v71_v2 = vunpack.c.l.s4 %v248_v1  ;;  %v53_v5 = vmul.f32 %v51_v3, %v51_v3  ;;  %v56_v6 = vsub.f32 1.0, %v51_v3  ;;  %v55_v7 = vsub.f32 1.0, %v52_v4  ;;  %s230_s6 = scalar_lea.hbm %s303_s2, 16 }
  0x27   :  { %v64_v9 = vshrl.u32 %v63_v0, 7  ;;  %vm145_vm1 = vcmask 1041408   ;;  %p231_p2 = scmp.ne.s32.totalorder %s303_s2, %s230_s6  ;;  %p234_p3 = scmp.lt.u32.totalorder %s230_s6, %s303_s2 }
  0x28   :  { %v57_v8 = vmax.f32 %v56_v6, 0.0  ;;  %v72_v10 = vunpack.c.0.s8 %v71_v2  ;;  %v54_v11 = vmul.f32 %v53_v5, %v52_v4 }
  0x29   :  { %vm67_vm0 = vcmp.lt.s32.totalorder %v64_v9, 2  ;;  %p236_p4 = pnand %p234_p3, %p231_p2 }
  0x2a   :  { %v58_v12 = vmul.f32 %v57_v8, %v57_v8  ;;  %v75_v14 = vsub.s32 %v72_v10, %v64_v9 }
  0x2c   :  { %v59_v13 = vmul.f32 %v58_v12, %v55_v7 }
  0x2e   :  { %v60_v15 = vadd.f32 %v59_v13, %v54_v11 }
  0x30   :  { %v69_v16 = vcombine.high %v60_v15, %v60_v15  ;;  %v76_v17 = vrot.slane %v60_v15, %v75_v14 }
  0x32   :  { %v83_v18 = vrot.slane %v69_v16, %v75_v14  ;;  %v84_v19 = vcombine.high %v76_v17, %v76_v17  ;;  %v90_v20 = vsel %vm67_vm0, %v76_v17, 0.0 }
  0x34   :  { %v85_v21 = vcombine.high %v83_v18, %v83_v18  ;;  %v91_v22 = vsel %vm67_vm0, %v84_v19, 0.0  ;;  %v92_v23 = vsel %vm67_vm0, %v83_v18, 0.0 }
  0x35   :  { %v99_v24 = vcombine.low %v90_v20, %v91_v22 }
  0x36   :  { %v93_v25 = vsel %vm67_vm0, %v85_v21, 0.0 }
  0x37   :  { %v100_v26 = vcombine.low %v92_v23, %v93_v25  ;;  %v107_v27 = vrot.slane %v99_v24, %v75_v14 }
  0x39   :  { %v114_v28 = vrot.slane %v100_v26, %v75_v14 }
  0x3b   :  { %v115_v29 = vcombine.low %v107_v27, %v114_v28  ;;  %v179_v30 = vcombine.low %v114_v28, %v114_v28 }
  0x3d   :  { %v131_v31 = vrot.slane %v115_v29, %v75_v14  ;;  %v138_v32 = vrot.slane %v179_v30, %v75_v14 }
  0x3f   :  { %v139_v33 = vcombine.high %v131_v31, %v131_v31  ;;  %v140_v34 = vcombine.high %v138_v32, %v138_v32  ;;  %v146_v35 = vsel %vm145_vm1, %v131_v31, 0.0  ;;  %v149_v37 = vsel %vm145_vm1, %v138_v32, 0.0 }
  0x41   :  { %v147_v36 = vsel %vm145_vm1, %v139_v33, 0.0  ;;  %v151_v39 = vsel %vm145_vm1, %v140_v34, 0.0 }
  0x42   :  { %v148_v38 = vadd.f32 %v147_v36, %v146_v35 }
  0x44   :  { %v150_v40 = vadd.f32 %v149_v37, %v148_v38 }
  0x46   :  { %v152_v41 = vadd.f32 %v151_v39, %v150_v40 }
  0x48   :  { %153 = vadd.xlane.f32.xlu0 %v152_v41 }
  0xd5   :  { %v154_v42 = vpop.xlane.xlu0 %153 }
  0xd6   :  { %v155_v43 = vrot.slane %v154_v42, 4 }
  0xd8   :  { %v156_v44 = vadd.f32 %v155_v43, %v154_v42 }
  0xda   :  { %v157_v45 = vrot.slane %v156_v44, 2 }
  0xdc   :  { %v158_v46 = vadd.f32 %v157_v45, %v156_v44 }
  0xde   :  { %v159_v47 = vrot.slane %v158_v46, 1 }
  0xe0   :  { %v160_v48 = vadd.f32 %v159_v47, %v158_v46 }
  0xe2   :  { %180 = vpush %v160_v48 }
 0x113   :  { %s181_s1 = spop %180 }
 0x114   :  { %163 = sst [smem:[#allocation8]] %s181_s1 }
 0x115   :  { %239 = shalt.err (!%p236_p4)
}
 0x116   :  { %s249_s11 = smov [#allocation8]  }
 0x117   :  { %171 = dma.smem_to_hbm %s249_s11, 16, %s303_s2, [#allocation5]  }
 0x118   :  { %244 = dma.done.wait [#allocation5], 16  }
 0x119   :  { %245 = vsyncadd [#allocation5], 4294967280 }
 0x11a   :  { %175 = sfence }
 0x11b   :  { %176 = vsyncpa [#allocation4], 1 }
 0x11c   :  { %177 = vsyncpa [#allocation7], 1 }
 0x11d   :  { %178 = vsyncpa [#allocation5], 1 }

</bundles_post_ra>
